<compile_context>
chip_gen: v7x
topology: tpu7x:2x2x1
jax: 0.10.0
libtpu: 0.0.40
codegen_flags: <defaults>
</compile_context>

<pallas_src>
import jax
import jax.numpy as jnp
from jax import lax
from jax.experimental import pallas as pl
from jax.experimental.pallas import tpu as pltpu

EPS = 1e-5


def _make_kernel(identity_shortcut):
    def kernel(x_ref, s1_ref, b1_ref, w1_ref, b2_ref, w2_ref, *rest):
        """One batch-block per grid step.

        Shapes (per step):
          x_ref:   (BB, H, W*Cin)        bf16  lane-dense input block
          s1/b1:   (1, W*Cin)            f32   folded BN1 scale / shift (tiled over W)
          w1_ref:  (3, W*Cin, W*Cout)    bf16  banded conv1 weights (kx + W-padding +
                                               BN2 scale folded in), one slab per ky
          b2_ref:  (1, W*Cout)           f32   folded BN2 shift (tiled over W)
          w2_ref:  (3, W*Cout, W*Cout)   bf16  banded conv2 weights
          wsc_ref: (W*Cin, W*Cout)       bf16  block-diagonal 1x1 shortcut (projection only)
          out_ref: (BB, H, W*Cout)       f32   lane-dense output block
        """
        if identity_shortcut:
            (out_ref,) = rest
        else:
            wsc_ref, out_ref = rest

        BB, H, WCin = x_ref.shape
        WCout = out_ref.shape[-1]
        M = BB * H

        xb = x_ref[...].reshape(M, WCin)                 # bf16, lane-dense
        x = xb.astype(jnp.float32)

        # --- BN1 (folded) + ReLU: dense f32 VPU work on (M, W*Cin). -------------
        h1 = jnp.maximum(x * s1_ref[...] + b1_ref[...], 0.0)
        h1b = h1.astype(jnp.bfloat16)                    # single cast of the whole operand

        def conv3x3(lhs_bf16, w_ref):
            # lhs: (M, K) bf16.  w_ref[ky]: (K, W*Cout) banded weight (kx offsets and
            # zero padding along W are folded into the band structure).
            p = [jnp.dot(lhs_bf16, w_ref[ky],
                         preferred_element_type=jnp.float32).reshape(BB, H, WCout)
                 for ky in range(3)]
            # out[h] = p0[h-1] + p1[h] + p2[h+1]  (zero rows at each image's edge).
            z = jnp.zeros((BB, 1, WCout), jnp.float32)
            return (p[1]
                    + jnp.concatenate([z, p[0][:, :H - 1, :]], axis=1)
                    + jnp.concatenate([p[2][:, 1:, :], z], axis=1))

        # --- conv1 (BN2 scale folded into weights) -------------------------------
        conv1 = conv3x3(h1b, w1_ref)                     # (BB, H, W*Cout) f32

        # --- dropout: identity (eval).  BN2 shift + ReLU. ------------------------
        h2 = jnp.maximum(conv1 + b2_ref[...].reshape(1, 1, WCout), 0.0)
        h2b = h2.reshape(M, WCout).astype(jnp.bfloat16)

        # --- shortcut seeds the accumulator --------------------------------------
        if identity_shortcut:
            acc = x.reshape(BB, H, WCout)                # f32 residual, no matmul
        else:
            acc = jnp.dot(xb, wsc_ref[...],
                          preferred_element_type=jnp.float32).reshape(BB, H, WCout)

        # --- conv2 + residual, lane-dense f32 store ------------------------------
        out_ref[...] = acc + conv3x3(h2b, w2_ref)

    return kernel


def _banded_3x3(w_oihw, W, col_scale=None):
    """(Cout,Cin,3,3) -> (3, W*Cin, W*Cout) banded matrices; kx offsets and the
    zero padding along W are encoded in the band structure (built once, wrapper side)."""
    Cout, Cin = w_oihw.shape[0], w_oihw.shape[1]
    wt = jnp.transpose(w_oihw, (2, 3, 1, 0)).astype(jnp.float32)   # (ky, kx, Cin, Cout)
    if col_scale is not None:
        wt = wt * col_scale.reshape(1, 1, 1, Cout)
    kx = jnp.arange(3).reshape(3, 1, 1)
    src = jnp.arange(W).reshape(1, W, 1)
    dst = jnp.arange(W).reshape(1, 1, W)
    sel = (src == dst + kx - 1).astype(jnp.float32)                # (3, W_src, W_out)
    band = jnp.einsum('xsw,yxco->yscwo', sel, wt)                  # (3, W, Cin, W, Cout)
    return band.reshape(3, W * Cin, W * Cout)


def _blockdiag_1x1(wsc_oihw, W):
    """(Cout,Cin,1,1) -> (W*Cin, W*Cout) block-diagonal shortcut projection."""
    wt = jnp.transpose(wsc_oihw[:, :, 0, 0], (1, 0)).astype(jnp.float32)   # (Cin, Cout)
    bd = jnp.einsum('sw,co->scwo', jnp.eye(W, dtype=jnp.float32), wt)
    return bd.reshape(W * wt.shape[0], W * wt.shape[1])


def wide_basic_block(x_nchw, params, stride=1, batch_block=8):
    """Wrapper: NCHW in -> NCHW out; kernel works on lane-dense (BB, H, W*C) blocks."""
    assert stride == 1, "TODO(synk): stride > 1 not implemented in the kernel"
    (g1, be1, m1, v1, w1_oihw, g2, be2, m2, v2, w2_oihw, wsc_oihw) = params

    N, Cin, H, W = x_nchw.shape
    Cout = w1_oihw.shape[0]
    identity = (wsc_oihw is None) and (Cin == Cout)

    # Batch-block size: largest divisor of N up to `batch_block` (per-step blocks stay
    # small enough for v7x's 64 MiB VMEM at these channel counts; re-derive for WRN
    # widths of 160-640).  For production N, grid length N//BB stays even for the two
    # v7x TensorCores.
    BB = 1
    for d in range(1, min(N, batch_block) + 1):
        if N % d == 0:
            BB = d

    # Fold BatchNorm (inference) into per-channel scale/shift, pre-tiled lane-dense.
    inv1 = 1.0 / jnp.sqrt(v1 + EPS)
    s1 = jnp.tile(g1 * inv1, W).reshape(1, W * Cin).astype(jnp.float32)
    b1 = jnp.tile(be1 - m1 * g1 * inv1, W).reshape(1, W * Cin).astype(jnp.float32)
    inv2 = 1.0 / jnp.sqrt(v2 + EPS)
    s2c = g2 * inv2                                   # folded into conv1's banded weights
    b2 = jnp.tile(be2 - m2 * g2 * inv2, W).reshape(1, W * Cout).astype(jnp.float32)

    w1b = _banded_3x3(w1_oihw, W, col_scale=s2c).astype(jnp.bfloat16)
    w2b = _banded_3x3(w2_oihw, W).astype(jnp.bfloat16)

    # Lane-dense bf16 input: (N, H, W*Cin).  No wrapper-side spatial pad.
    x = jnp.transpose(x_nchw, (0, 2, 3, 1)).reshape(N, H, W * Cin).astype(jnp.bfloat16)

    in_specs = [
        pl.BlockSpec((BB, H, W * Cin), lambda n: (n, 0, 0)),
        pl.BlockSpec((1, W * Cin), lambda n: (0, 0)),
        pl.BlockSpec((1, W * Cin), lambda n: (0, 0)),
        pl.BlockSpec((3, W * Cin, W * Cout), lambda n: (0, 0, 0)),
        pl.BlockSpec((1, W * Cout), lambda n: (0, 0)),
        pl.BlockSpec((3, W * Cout, W * Cout), lambda n: (0, 0, 0)),
    ]
    args = [x, s1, b1, w1b, b2, w2b]
    if not identity:
        wscb = _blockdiag_1x1(wsc_oihw, W).astype(jnp.bfloat16)
        in_specs.append(pl.BlockSpec((W * Cin, W * Cout), lambda n: (0, 0)))
        args.append(wscb)

    out = pl.pallas_call(
        _make_kernel(identity),
        out_shape=jax.ShapeDtypeStruct((N, H, W * Cout), jnp.float32),
        grid=(N // BB,),
        in_specs=in_specs,
        out_specs=pl.BlockSpec((BB, H, W * Cout), lambda n: (n, 0, 0)),
        compiler_params=pltpu.CompilerParams(
            dimension_semantics=("parallel",)),
    )(*args)

    out = out.reshape(N, H, W, Cout)
    return jnp.transpose(out, (0, 3, 1, 2))           # back to NCHW


def reference(x_nchw, params):
    """Pure-JAX reference of the same forward (inference mode)."""
    (g1, be1, m1, v1, w1_oihw, g2, be2, m2, v2, w2_oihw, wsc_oihw) = params
    x = jnp.transpose(x_nchw, (0, 2, 3, 1))           # NHWC

    def bn(y, g, b, m, v):
        return g * (y - m) / jnp.sqrt(v + EPS) + b

    def conv(y, w_oihw, pad):
        w = jnp.transpose(w_oihw, (2, 3, 1, 0))        # HWIO
        return lax.conv_general_dilated(
            y, w, window_strides=(1, 1), padding=pad,
            dimension_numbers=("NHWC", "HWIO", "NHWC"))

    h = jnp.maximum(bn(x, g1, be1, m1, v1), 0.0)
    h = conv(h, w1_oihw, "SAME")
    h = jnp.maximum(bn(h, g2, be2, m2, v2), 0.0)
    h = conv(h, w2_oihw, "SAME")
    sc = x if wsc_oihw is None else conv(x, wsc_oihw, "VALID")
    return jnp.transpose(h + sc, (0, 3, 1, 2))


def make_params(key, in_planes, planes):
    ks = jax.random.split(key, 11)
    g1 = jax.random.normal(ks[0], (in_planes,)) * 0.1 + 1.0
    be1 = jax.random.normal(ks[1], (in_planes,)) * 0.1
    m1 = jax.random.normal(ks[2], (in_planes,)) * 0.1
    v1 = jax.random.uniform(ks[3], (in_planes,), minval=0.5, maxval=1.5)
    w1 = jax.random.normal(ks[4], (planes, in_planes, 3, 3)) * 0.1
    g2 = jax.random.normal(ks[5], (planes,)) * 0.1 + 1.0
    be2 = jax.random.normal(ks[6], (planes,)) * 0.1
    m2 = jax.random.normal(ks[7], (planes,)) * 0.1
    v2 = jax.random.uniform(ks[8], (planes,), minval=0.5, maxval=1.5)
    w2 = jax.random.normal(ks[9], (planes, planes, 3, 3)) * 0.1
    wsc = jax.random.normal(ks[10], (planes, in_planes, 1, 1)) * 0.1
    return tuple(p.astype(jnp.float32)
                 for p in (g1, be1, m1, v1, w1, g2, be2, m2, v2, w2, wsc))


if __name__ == "__main__":
    key = jax.random.PRNGKey(0)
    kx, kp = jax.random.split(key)

    N, Cin, Cout, H, W = 2, 4, 8, 16, 16   # in_planes=4, planes=8, stride=1
    x = jax.random.normal(kx, (N, Cin, H, W), dtype=jnp.float32)
    params = make_params(kp, Cin, Cout)

    out = jax.block_until_ready(wide_basic_block(x, params))
    ref = jax.block_until_ready(reference(x, params))

    assert out.shape == (N, Cout, H, W), out.shape
    # bf16 input / bf16 MXU operands (f32 accumulation): tolerance 2e-2.
    assert jnp.allclose(out, ref, rtol=2e-2, atol=2e-2), float(
        jnp.max(jnp.abs(out - ref)))
    print("KERNEL_OK")
</pallas_src>

<mosaic_0001>
module attributes {stable_mosaic.version = 11 : i64} {
  func.func @kernel(%arg0: i32, %arg1: memref<2x16x64xbf16, #tpu.memory_space<vmem>>, %arg2: memref<1x64xf32, #tpu.memory_space<vmem>>, %arg3: memref<1x64xf32, #tpu.memory_space<vmem>>, %arg4: memref<3x64x128xbf16, #tpu.memory_space<vmem>>, %arg5: memref<1x128xf32, #tpu.memory_space<vmem>>, %arg6: memref<3x128x128xbf16, #tpu.memory_space<vmem>>, %arg7: memref<64x128xbf16, #tpu.memory_space<vmem>>, %arg8: memref<2x16x128xf32, #tpu.memory_space<vmem>>) attributes {dimension_semantics = [#tpu.dimension_semantics<parallel>], iteration_bounds = array<i64: 1>, scalar_prefetch = 0 : i64, scratch_operands = 0 : i64, tpu.core_type = #tpu.core_type<tc>, window_params = [{transform_indices = @transform_0, window_bounds = array<i64: 2, 16, 64>}, {pipeline_mode = #tpu.pipeline_mode<synchronous>, transform_indices = @transform_1, window_bounds = array<i64: 1, 64>}, {pipeline_mode = #tpu.pipeline_mode<synchronous>, transform_indices = @transform_2, window_bounds = array<i64: 1, 64>}, {pipeline_mode = #tpu.pipeline_mode<synchronous>, transform_indices = @transform_3, window_bounds = array<i64: 3, 64, 128>}, {pipeline_mode = #tpu.pipeline_mode<synchronous>, transform_indices = @transform_4, window_bounds = array<i64: 1, 128>}, {pipeline_mode = #tpu.pipeline_mode<synchronous>, transform_indices = @transform_5, window_bounds = array<i64: 3, 128, 128>}, {pipeline_mode = #tpu.pipeline_mode<synchronous>, transform_indices = @transform_6, window_bounds = array<i64: 64, 128>}, {transform_indices = @transform_7, window_bounds = array<i64: 2, 16, 128>}]} {
    %c0 = arith.constant 0 : index
    %c0_0 = arith.constant 0 : index
    %c0_1 = arith.constant 0 : index
    %0 = vector.load %arg1[%c0, %c0_0, %c0_1] : memref<2x16x64xbf16, #tpu.memory_space<vmem>>, vector<2x16x64xbf16>
    %1 = vector.shape_cast %0 : vector<2x16x64xbf16> to vector<32x64xbf16>
    %2 = arith.extf %1 : vector<32x64xbf16> to vector<32x64xf32>
    %c0_2 = arith.constant 0 : index
    %c0_3 = arith.constant 0 : index
    %3 = vector.load %arg2[%c0_2, %c0_3] : memref<1x64xf32, #tpu.memory_space<vmem>>, vector<1x64xf32>
    %4 = vector.broadcast %3 : vector<1x64xf32> to vector<32x64xf32>
    %5 = arith.mulf %2, %4 : vector<32x64xf32>
    %c0_4 = arith.constant 0 : index
    %c0_5 = arith.constant 0 : index
    %6 = vector.load %arg3[%c0_4, %c0_5] : memref<1x64xf32, #tpu.memory_space<vmem>>, vector<1x64xf32>
    %7 = vector.broadcast %6 : vector<1x64xf32> to vector<32x64xf32>
    %8 = arith.addf %5, %7 : vector<32x64xf32>
    %cst = arith.constant 0.000000e+00 : f32
    %9 = vector.broadcast %cst : f32 to vector<32x64xf32>
    %10 = arith.maximumf %8, %9 : vector<32x64xf32>
    %11 = arith.truncf %10 : vector<32x64xf32> to vector<32x64xbf16>
    %c0_6 = arith.constant 0 : index
    %c0_7 = arith.constant 0 : index
    %c0_8 = arith.constant 0 : index
    %12 = vector.load %arg4[%c0_6, %c0_7, %c0_8] : memref<3x64x128xbf16, #tpu.memory_space<vmem>>, vector<1x64x128xbf16>
    %13 = vector.shape_cast %12 : vector<1x64x128xbf16> to vector<64x128xbf16>
    %cst_9 = arith.constant dense<0.000000e+00> : vector<32x128xf32>
    %14 = tpu.matmul %11, %13, %cst_9 {dimension_numbers = #tpu.dot_dimension_numbers<[1], [0], [0], [1], [0, 0, 1, 1], [], []>} : vector<32x64xbf16>, vector<64x128xbf16>, vector<32x128xf32> -> vector<32x128xf32>
    %15 = vector.shape_cast %14 : vector<32x128xf32> to vector<2x16x128xf32>
    %c1 = arith.constant 1 : index
    %c0_10 = arith.constant 0 : index
    %c0_11 = arith.constant 0 : index
    %16 = vector.load %arg4[%c1, %c0_10, %c0_11] : memref<3x64x128xbf16, #tpu.memory_space<vmem>>, vector<1x64x128xbf16>
    %17 = vector.shape_cast %16 : vector<1x64x128xbf16> to vector<64x128xbf16>
    %cst_12 = arith.constant dense<0.000000e+00> : vector<32x128xf32>
    %18 = tpu.matmul %11, %17, %cst_12 {dimension_numbers = #tpu.dot_dimension_numbers<[1], [0], [0], [1], [0, 0, 1, 1], [], []>} : vector<32x64xbf16>, vector<64x128xbf16>, vector<32x128xf32> -> vector<32x128xf32>
    %19 = vector.shape_cast %18 : vector<32x128xf32> to vector<2x16x128xf32>
    %c2 = arith.constant 2 : index
    %c0_13 = arith.constant 0 : index
    %c0_14 = arith.constant 0 : index
    %20 = vector.load %arg4[%c2, %c0_13, %c0_14] : memref<3x64x128xbf16, #tpu.memory_space<vmem>>, vector<1x64x128xbf16>
    %21 = vector.shape_cast %20 : vector<1x64x128xbf16> to vector<64x128xbf16>
    %cst_15 = arith.constant dense<0.000000e+00> : vector<32x128xf32>
    %22 = tpu.matmul %11, %21, %cst_15 {dimension_numbers = #tpu.dot_dimension_numbers<[1], [0], [0], [1], [0, 0, 1, 1], [], []>} : vector<32x64xbf16>, vector<64x128xbf16>, vector<32x128xf32> -> vector<32x128xf32>
    %23 = vector.shape_cast %22 : vector<32x128xf32> to vector<2x16x128xf32>
    %cst_16 = arith.constant 0.000000e+00 : f32
    %24 = vector.broadcast %cst_16 : f32 to vector<2x1x128xf32>
    %25 = vector.extract_strided_slice %15 {offsets = [0, 0, 0], sizes = [2, 15, 128], strides = [1, 1, 1]} : vector<2x16x128xf32> to vector<2x15x128xf32>
    %26 = tpu.concatenate %24, %25 in 1 : vector<2x1x128xf32>, vector<2x15x128xf32> -> vector<2x16x128xf32>
    %27 = arith.addf %19, %26 : vector<2x16x128xf32>
    %28 = vector.extract_strided_slice %23 {offsets = [0, 1, 0], sizes = [2, 15, 128], strides = [1, 1, 1]} : vector<2x16x128xf32> to vector<2x15x128xf32>
    %29 = tpu.concatenate %28, %24 in 1 : vector<2x15x128xf32>, vector<2x1x128xf32> -> vector<2x16x128xf32>
    %30 = arith.addf %27, %29 : vector<2x16x128xf32>
    %c0_17 = arith.constant 0 : index
    %c0_18 = arith.constant 0 : index
    %31 = vector.load %arg5[%c0_17, %c0_18] : memref<1x128xf32, #tpu.memory_space<vmem>>, vector<1x128xf32>
    %32 = vector.shape_cast %31 : vector<1x128xf32> to vector<1x1x128xf32>
    %33 = vector.broadcast %32 : vector<1x1x128xf32> to vector<2x16x128xf32>
    %34 = arith.addf %30, %33 : vector<2x16x128xf32>
    %cst_19 = arith.constant 0.000000e+00 : f32
    %35 = vector.broadcast %cst_19 : f32 to vector<2x16x128xf32>
    %36 = arith.maximumf %34, %35 : vector<2x16x128xf32>
    %37 = vector.shape_cast %36 : vector<2x16x128xf32> to vector<32x128xf32>
    %38 = arith.truncf %37 : vector<32x128xf32> to vector<32x128xbf16>
    %c0_20 = arith.constant 0 : index
    %c0_21 = arith.constant 0 : index
    %39 = vector.load %arg7[%c0_20, %c0_21] : memref<64x128xbf16, #tpu.memory_space<vmem>>, vector<64x128xbf16>
    %cst_22 = arith.constant dense<0.000000e+00> : vector<32x128xf32>
    %40 = tpu.matmul %1, %39, %cst_22 {dimension_numbers = #tpu.dot_dimension_numbers<[1], [0], [0], [1], [0, 0, 1, 1], [], []>} : vector<32x64xbf16>, vector<64x128xbf16>, vector<32x128xf32> -> vector<32x128xf32>
    %41 = vector.shape_cast %40 : vector<32x128xf32> to vector<2x16x128xf32>
    %c0_23 = arith.constant 0 : index
    %c0_24 = arith.constant 0 : index
    %c0_25 = arith.constant 0 : index
    %42 = vector.load %arg6[%c0_23, %c0_24, %c0_25] : memref<3x128x128xbf16, #tpu.memory_space<vmem>>, vector<1x128x128xbf16>
    %43 = vector.shape_cast %42 : vector<1x128x128xbf16> to vector<128x128xbf16>
    %cst_26 = arith.constant dense<0.000000e+00> : vector<32x128xf32>
    %44 = tpu.matmul %38, %43, %cst_26 {dimension_numbers = #tpu.dot_dimension_numbers<[1], [0], [0], [1], [0, 0, 1, 1], [], []>} : vector<32x128xbf16>, vector<128x128xbf16>, vector<32x128xf32> -> vector<32x128xf32>
    %45 = vector.shape_cast %44 : vector<32x128xf32> to vector<2x16x128xf32>
    %c1_27 = arith.constant 1 : index
    %c0_28 = arith.constant 0 : index
    %c0_29 = arith.constant 0 : index
    %46 = vector.load %arg6[%c1_27, %c0_28, %c0_29] : memref<3x128x128xbf16, #tpu.memory_space<vmem>>, vector<1x128x128xbf16>
    %47 = vector.shape_cast %46 : vector<1x128x128xbf16> to vector<128x128xbf16>
    %cst_30 = arith.constant dense<0.000000e+00> : vector<32x128xf32>
    %48 = tpu.matmul %38, %47, %cst_30 {dimension_numbers = #tpu.dot_dimension_numbers<[1], [0], [0], [1], [0, 0, 1, 1], [], []>} : vector<32x128xbf16>, vector<128x128xbf16>, vector<32x128xf32> -> vector<32x128xf32>
    %49 = vector.shape_cast %48 : vector<32x128xf32> to vector<2x16x128xf32>
    %c2_31 = arith.constant 2 : index
    %c0_32 = arith.constant 0 : index
    %c0_33 = arith.constant 0 : index
    %50 = vector.load %arg6[%c2_31, %c0_32, %c0_33] : memref<3x128x128xbf16, #tpu.memory_space<vmem>>, vector<1x128x128xbf16>
    %51 = vector.shape_cast %50 : vector<1x128x128xbf16> to vector<128x128xbf16>
    %cst_34 = arith.constant dense<0.000000e+00> : vector<32x128xf32>
    %52 = tpu.matmul %38, %51, %cst_34 {dimension_numbers = #tpu.dot_dimension_numbers<[1], [0], [0], [1], [0, 0, 1, 1], [], []>} : vector<32x128xbf16>, vector<128x128xbf16>, vector<32x128xf32> -> vector<32x128xf32>
    %53 = vector.shape_cast %52 : vector<32x128xf32> to vector<2x16x128xf32>
    %cst_35 = arith.constant 0.000000e+00 : f32
    %54 = vector.broadcast %cst_35 : f32 to vector<2x1x128xf32>
    %55 = vector.extract_strided_slice %45 {offsets = [0, 0, 0], sizes = [2, 15, 128], strides = [1, 1, 1]} : vector<2x16x128xf32> to vector<2x15x128xf32>
    %56 = tpu.concatenate %54, %55 in 1 : vector<2x1x128xf32>, vector<2x15x128xf32> -> vector<2x16x128xf32>
    %57 = arith.addf %49, %56 : vector<2x16x128xf32>
    %58 = vector.extract_strided_slice %53 {offsets = [0, 1, 0], sizes = [2, 15, 128], strides = [1, 1, 1]} : vector<2x16x128xf32> to vector<2x15x128xf32>
    %59 = tpu.concatenate %58, %54 in 1 : vector<2x15x128xf32>, vector<2x1x128xf32> -> vector<2x16x128xf32>
    %60 = arith.addf %57, %59 : vector<2x16x128xf32>
    %61 = arith.addf %41, %60 : vector<2x16x128xf32>
    %c0_36 = arith.constant 0 : index
    %c0_37 = arith.constant 0 : index
    %c0_38 = arith.constant 0 : index
    %62 = vector.load %arg8[%c0_36, %c0_37, %c0_38] : memref<2x16x128xf32, #tpu.memory_space<vmem>>, vector<2x16x128xf32>
    tpu.vector_store %arg8[%c0_36, %c0_37, %c0_38], %61 {strides = array<i32>} : memref<2x16x128xf32, #tpu.memory_space<vmem>>, vector<2x16x128xf32>,
    return
  }
  func.func @transform_0(%arg0: i32) -> (i32, i32, i32) {
    %c0_i32 = arith.constant 0 : i32
    %c0_i32_0 = arith.constant 0 : i32
    %c0_i32_1 = arith.constant 0 : i32
    return %arg0, %c0_i32, %c0_i32_0 : i32, i32, i32
  }
  func.func @transform_1(%arg0: i32) -> (i32, i32) {
    %c0_i32 = arith.constant 0 : i32
    %c0_i32_0 = arith.constant 0 : i32
    %c0_i32_1 = arith.constant 0 : i32
    return %c0_i32, %c0_i32_0 : i32, i32
  }
  func.func @transform_2(%arg0: i32) -> (i32, i32) {
    %c0_i32 = arith.constant 0 : i32
    %c0_i32_0 = arith.constant 0 : i32
    %c0_i32_1 = arith.constant 0 : i32
    return %c0_i32, %c0_i32_0 : i32, i32
  }
  func.func @transform_3(%arg0: i32) -> (i32, i32, i32) {
    %c0_i32 = arith.constant 0 : i32
    %c0_i32_0 = arith.constant 0 : i32
    %c0_i32_1 = arith.constant 0 : i32
    %c0_i32_2 = arith.constant 0 : i32
    return %c0_i32, %c0_i32_0, %c0_i32_1 : i32, i32, i32
  }
  func.func @transform_4(%arg0: i32) -> (i32, i32) {
    %c0_i32 = arith.constant 0 : i32
    %c0_i32_0 = arith.constant 0 : i32
    %c0_i32_1 = arith.constant 0 : i32
    return %c0_i32, %c0_i32_0 : i32, i32
  }
  func.func @transform_5(%arg0: i32) -> (i32, i32, i32) {
    %c0_i32 = arith.constant 0 : i32
    %c0_i32_0 = arith.constant 0 : i32
    %c0_i32_1 = arith.constant 0 : i32
    %c0_i32_2 = arith.constant 0 : i32
    return %c0_i32, %c0_i32_0, %c0_i32_1 : i32, i32, i32
  }
  func.func @transform_6(%arg0: i32) -> (i32, i32) {
    %c0_i32 = arith.constant 0 : i32
    %c0_i32_0 = arith.constant 0 : i32
    %c0_i32_1 = arith.constant 0 : i32
    return %c0_i32, %c0_i32_0 : i32, i32
  }
  func.func @transform_7(%arg0: i32) -> (i32, i32, i32) {
    %c0_i32 = arith.constant 0 : i32
    %c0_i32_0 = arith.constant 0 : i32
    %c0_i32_1 = arith.constant 0 : i32
    return %arg0, %c0_i32, %c0_i32_0 : i32, i32, i32
  }
}

</mosaic_0001>

<bundles_post_ra>
// kernel: tpu_custom_call.1
= control target key start
LH: loop header
LB: loop body
LE: loop exit
PB: predicated region body
PF: predicated region fallthrough
CT: control target
= control target key end

     0   :  { %12 = vsyncpa [#allocation3], 0  ;;  %s1511_s0 = inlined_call_operand.hbm [shape: bf16[2,16,64], index: 0, kind: input, shape index: {}]   ;;  %s1512_s1 = inlined_call_operand.vmem [shape: f32[1,64], index: 1, kind: input, shape index: {}]   ;;  %s1513_s2 = inlined_call_operand.vmem [shape: f32[1,64], index: 2, kind: input, shape index: {}]   ;;  %s1514_s3 = inlined_call_operand.hbm [shape: bf16[3,64,128], index: 3, kind: input, shape index: {}]   ;;  %s1515_s4 = inlined_call_operand.vmem [shape: f32[1,128], index: 4, kind: input, shape index: {}]   ;;  %s1516_s5 = inlined_call_operand.hbm [shape: bf16[3,128,128], index: 5, kind: input, shape index: {}]   ;;  %s1517_s6 = inlined_call_operand.hbm [shape: bf16[64,128], index: 6, kind: input, shape index: {}]   ;;  %s1518_s7 = inlined_call_operand.hbm [shape: f32[2,16,128], index: 7, kind: output, shape index: {}]  }
   0x1   :  { %13 = vsyncpa [#allocation6], 0 }
   0x2   :  { %14 = vsyncpa [#allocation9], 0 }
   0x3   :  { %15 = vsyncpa [#allocation4], 0  ;;  %s1333_s24 = smov [#allocation5]   ;;  %s1334_s26 = smov [#allocation2]  }
   0x4   :  { %s37_s25 = sshll.u32 %s1333_s24, 4  ;;  %s21_s27 = sshll.u32 %s1334_s26, 4  ;;  %s38_s25 = int_to_ptr.vmem [resolvable:$true] %s37_s25  ;;  %s1382_s27 = int_to_ptr.vmem [resolvable:$true] %s21_s27 }
   0x5   :  { %s1215_s30 = scalar_lea.hbm %s1514_s3, 1536 }
   0x6   :  { %p1216_p0 = scmp.ne.s32.totalorder %s1514_s3, %s1215_s30  ;;  %p1219_p1 = scmp.lt.u32.totalorder %s1215_s30, %s1514_s3 }
   0x8   :  { %p1221_p2 = pnand %p1219_p1, %p1216_p0 }
   0xa   :  { %1224 = shalt.err (!%p1221_p2)
}
   0xb   :  { %s1225_s12 = scalar_lea.vmem %s38_s25, 1536  ;;  %p1230_p4 = scmp.lt.s32.totalorder %s38_s25, %s38_s25 }
   0xc   :  { %p1226_p3 = scmp.ne.s32.totalorder %s38_s25, %s1225_s12  ;;  %p1231_p5 = scmp.lt.s32.totalorder %s1225_s12, %s1225_s12 }
   0xe   :  { %p1232_p6 = por %p1231_p5, %p1230_p4 }
  0x10   :  { %p1233_p7 = pnand %p1232_p6, %p1226_p3 }
  0x12   :  { %1236 = shalt.err (!%p1233_p7)
}
  0x13   :  { %s1335_s13 = smov 64   ;;  %s1336_s14 = smov 4  }
  0x14   :  { %43 = dma.hbm_to_vmem [thread:$0]  %s1514_s3, 1536, %s38_s25, [#allocation6], %s1335_s13, %s1335_s13, %s1336_s14  }
  0x15   :  { %s1237_s19 = scalar_lea.hbm %s1511_s0, 256 }
  0x16   :  { %p1238_p8 = scmp.ne.s32.totalorder %s1511_s0, %s1237_s19  ;;  %p1241_p9 = scmp.lt.u32.totalorder %s1237_s19, %s1511_s0 }
  0x18   :  { %p1243_p10 = pnand %p1241_p9, %p1238_p8 }
  0x1a   :  { %1246 = shalt.err (!%p1243_p10)
}
  0x1b   :  { %s1247_s24 = scalar_lea.vmem %s1382_s27, 256  ;;  %p1252_p12 = scmp.lt.s32.totalorder %s1382_s27, %s1382_s27 }
  0x1c   :  { %p1248_p11 = scmp.ne.s32.totalorder %s1382_s27, %s1247_s24  ;;  %p1253_p13 = scmp.lt.s32.totalorder %s1247_s24, %s1247_s24 }
  0x1e   :  { %p1254_p0 = por %p1253_p13, %p1252_p12 }
  0x20   :  { %p1255_p1 = pnand %p1254_p0, %p1248_p11 }
  0x22   :  { %1258 = shalt.err (!%p1255_p1)
}
  0x23   :  { %27 = dma.hbm_to_vmem [thread:$0]  %s1511_s0, 256, %s1382_s27, [#allocation3], %s1335_s13, %s1335_s13, %s1336_s14  }
  0x24   :  { %s1337_s26 = smov [#allocation7]   ;;  %s1338_s29 = smov [#allocation8]  }
  0x25   :  { %s51_s28 = sshll.u32 %s1337_s26, 4  ;;  %s63_s30 = sshll.u32 %s1338_s29, 4  ;;  %s52_s28 = int_to_ptr.vmem [resolvable:$true] %s51_s28  ;;  %s1419_s30 = int_to_ptr.vmem [resolvable:$true] %s63_s30 }
  0x26   :  { %s1259_s10 = scalar_lea.hbm %s1516_s5, 3072 }
  0x27   :  { %p1260_p2 = scmp.ne.s32.totalorder %s1516_s5, %s1259_s10  ;;  %p1263_p3 = scmp.lt.u32.totalorder %s1259_s10, %s1516_s5 }
  0x29   :  { %p1265_p4 = pnand %p1263_p3, %p1260_p2 }
  0x2b   :  { %1268 = shalt.err (!%p1265_p4)
}
  0x2c   :  { %s1269_s0 = scalar_lea.vmem %s52_s28, 3072  ;;  %p1274_p6 = scmp.lt.s32.totalorder %s52_s28, %s52_s28 }
  0x2d   :  { %p1270_p5 = scmp.ne.s32.totalorder %s52_s28, %s1269_s0  ;;  %p1275_p7 = scmp.lt.s32.totalorder %s1269_s0, %s1269_s0 }
  0x2f   :  { %p1276_p8 = por %p1275_p7, %p1274_p6 }
  0x31   :  { %p1277_p9 = pnand %p1276_p8, %p1270_p5 }
  0x33   :  { %1280 = shalt.err (!%p1277_p9)
}
  0x34   :  { %57 = dma.hbm_to_vmem [thread:$0]  %s1516_s5, 3072, %s52_s28, [#allocation6], %s1335_s13, %s1335_s13, %s1336_s14  }
  0x35   :  { %s1281_s20 = scalar_lea.hbm %s1517_s6, 512 }
  0x36   :  { %p1282_p10 = scmp.ne.s32.totalorder %s1517_s6, %s1281_s20  ;;  %p1285_p11 = scmp.lt.u32.totalorder %s1281_s20, %s1517_s6 }
  0x38   :  { %p1287_p12 = pnand %p1285_p11, %p1282_p10 }
  0x3a   :  { %1290 = shalt.err (!%p1287_p12)
}
  0x3b   :  { %s1291_s3 = scalar_lea.vmem %s1419_s30, 512  ;;  %p1296_p0 = scmp.lt.s32.totalorder %s1419_s30, %s1419_s30 }
  0x3c   :  { %p1292_p13 = scmp.ne.s32.totalorder %s1419_s30, %s1291_s3  ;;  %p1297_p1 = scmp.lt.s32.totalorder %s1291_s3, %s1291_s3 }
  0x3e   :  { %p1298_p2 = por %p1297_p1, %p1296_p0 }
  0x40   :  { %p1299_p3 = pnand %p1298_p2, %p1292_p13 }
  0x42   :  { %1302 = shalt.err (!%p1299_p3)
}
  0x43   :  { %69 = dma.hbm_to_vmem [thread:$0]  %s1517_s6, 512, %s1419_s30, [#allocation9], %s1335_s13, %s1335_s13, %s1336_s14  }
  0x44   :  { %1325 = dma.done.wait [#allocation3], 256  }
  0x45   :  { %1326 = vsyncadd [#allocation3], 4294967040 }
  0x46   :  { %1327 = dma.done.wait [#allocation6], 4608  }
  0x47   :  { %1328 = vsyncadd [#allocation6], 4294962688 }
  0x48   :  { %1329 = dma.done.wait [#allocation9], 512  }
  0x49   :  { %1330 = vsyncadd [#allocation9], 4294966784  ;;  %v1171_v0 = vld [vmem:[#allocation5] sm:$0xff]   ;;  %v1172_v1 = vld [vmem:[#allocation5 + $0x8] sm:$0xff]   ;;  %vm151_vm0 = vcmask 523264   ;;  %vm375_vm1 = vcmask 1040384  }
  0x4a   :  { %1042 = vmatprep.subr.bf16.mxu1 %v1171_v0  ;;  %v1173_v2 = vld [vmem:[#allocation5 + $0x10] sm:$0xff]   ;;  %v1175_v3 = vld [vmem:[#allocation5 + $0x40] sm:$0xff]   ;;  %v1174_v6 = vld [vmem:[#allocation5 + $0x18] sm:$0xff]   ;;  %vm396_vm2 = vcmask 1046528  }
  0x4b   :  { %1043 = vmatpush3.bf16.msra.mxu1 %v1171_v0  ;;  %v1456_v4 = vld [vmem:[#allocation2] sm:$0xff]   ;;  %1066 = vmatprep.subr.bf16.mxu0 %v1175_v3  ;;  %v1463_v9 = vld [vmem:[#allocation2 + $0x8] sm:$0xff]   ;;  %v1177_v15 = vld [vmem:[#allocation5 + $0x48] sm:$0xff]  }
  0x4c   :  { %1044 = vmatprep.subr.bf16.mxu1 %v1172_v1  ;;  %v935_v5 = vld [vmem:[%s1512_s1] ss:$0 sm:$0xff]  ;;  %v87_v7 = vunpack.c.l.bf16 %v1456_v4  ;;  %v88_v8 = vunpack.c.h.bf16 %v1456_v4  ;;  %1067 = vmatpush3.bf16.msra.mxu0 %v1175_v3  ;;  %v89_v11 = vunpack.c.l.bf16 %v1463_v9  ;;  %v90_v12 = vunpack.c.h.bf16 %v1463_v9  ;;  %v1176_v25 = vld [vmem:[#allocation5 + $0x20] sm:$0xff]   ;;  %v1181_v26 = vld [vmem:[#allocation5 + $0x58] sm:$0xff]  }
  0x4d   :  { %v936_v10 = vld [vmem:[%s1513_s2] ss:$0 sm:$0xff]  ;;  %1068 = vmatprep.subr.bf16.mxu0 %v1177_v15  ;;  %v1178_v31 = vld [vmem:[#allocation5 + $0x28] sm:$0xff]   ;;  %v1187_v32 = vld [vmem:[#allocation7] sm:$0xff]  }
  0x4e   :  { %v98_v13 = vmul.f32 %v935_v5, %v87_v7  ;;  %v99_v14 = vmul.f32 %v935_v5, %v88_v8  ;;  %v100_v16 = vmul.f32 %v935_v5, %v89_v11  ;;  %v101_v17 = vmul.f32 %v935_v5, %v90_v12  ;;  %v1179_v20 = vld [vmem:[#allocation5 + $0x50] sm:$0xff]   ;;  %v1182_v34 = vld [vmem:[#allocation5 + $0x38] sm:$0xff]   ;;  %v1183_v35 = vld [vmem:[#allocation8] sm:$0xff]  }
  0x4f   :  { %1045 = vmatpush3.bf16.msra.mxu1 %v1172_v1  ;;  %v1180_v33 = vld [vmem:[#allocation5 + $0x30] sm:$0xff]   ;;  %v1184_v36 = vld [vmem:[#allocation8 + $0x8] sm:$0xff]   ;;  %v1186_v38 = vld [vmem:[#allocation8 + $0x18] sm:$0xff]  }
  0x50   :  { %1046 = vmatprep.subr.bf16.mxu1 %v1173_v2  ;;  %v109_v18 = vadd.f32 %v936_v10, %v98_v13  ;;  %v110_v19 = vadd.f32 %v936_v10, %v99_v14  ;;  %v111_v21 = vadd.f32 %v936_v10, %v100_v16  ;;  %v112_v22 = vadd.f32 %v936_v10, %v101_v17  ;;  %v1185_v37 = vld [vmem:[#allocation8 + $0x10] sm:$0xff]   ;;  %v1189_v39 = vld [vmem:[#allocation7 + $0x40] sm:$0xff]   ;;  %v1191_v40 = vld [vmem:[#allocation7 + $0x8] sm:$0xff]  }
  0x51   :  { %1069 = vmatpush3.bf16.msra.mxu0 %v1177_v15  ;;  %v1192_v41 = vld [vmem:[#allocation7 + $0x48] sm:$0xff]   ;;  %v1193_v42 = vld [vmem:[#allocation7 + $0x10] sm:$0xff]   ;;  %v1195_v44 = vld [vmem:[#allocation7 + $0x18] sm:$0xff]  }
  0x52   :  { %v113_v23 = vmax.f32 %v109_v18, 0.0  ;;  %v114_v24 = vmax.f32 %v110_v19, 0.0  ;;  %1070 = vmatprep.subr.bf16.mxu0 %v1179_v20  ;;  %v115_v27 = vmax.f32 %v111_v21, 0.0  ;;  %v116_v28 = vmax.f32 %v112_v22, 0.0  ;;  %v1194_v43 = vld [vmem:[#allocation7 + $0x50] sm:$0xff]   ;;  %v1196_v45 = vld [vmem:[#allocation7 + $0x58] sm:$0xff]  }
  0x53   :  { %1047 = vmatpush3.bf16.msra.mxu1 %v1173_v2  ;;  %v1197_v46 = vld [vmem:[#allocation7 + $0x20] sm:$0xff]   ;;  %v1199_v48 = vld [vmem:[#allocation7 + $0x28] sm:$0xff]   ;;  %v1201_v50 = vld [vmem:[#allocation7 + $0x30] sm:$0xff]  }
  0x54   :  { %1048 = vmatprep.subr.bf16.mxu1 %v1174_v6  ;;  %v117_v29 = vpack.c.bf16 %v114_v24, %v113_v23  ;;  %v118_v30 = vpack.c.bf16 %v116_v28, %v115_v27  ;;  %v1198_v47 = vld [vmem:[#allocation7 + $0x60] sm:$0xff]   ;;  %v1200_v49 = vld [vmem:[#allocation7 + $0x68] sm:$0xff]   ;;  %v1202_v51 = vld [vmem:[#allocation7 + $0x70] sm:$0xff]  }
  0x55   :  { %1071 = vmatpush3.bf16.msra.mxu0 %v1179_v20  ;;  %v1203_v52 = vld [vmem:[#allocation7 + $0x38] sm:$0xff]   ;;  %v1205_v54 = vld [vmem:[#allocation7 + $0x80] sm:$0xff]   ;;  %v955_v16 = vld [vmem:[%s1515_s4] ss:$0 sm:$0xff]  ;;  %s1339_s4 = smov [#allocation10]  }
  0x56   :  { %1050 = vmatprep.mubr.msk.bf16.mxu1 %vm151_vm0, %v117_v29  ;;  %1072 = vmatprep.subr.bf16.mxu0 %v1181_v26  ;;  %v1204_v53 = vld [vmem:[#allocation7 + $0x78] sm:$0xff]   ;;  %s921_s14 = sshll.u32 %s1339_s4, 4  ;;  %s922_s14 = int_to_ptr.vmem [resolvable:$true] %s921_s14 }
  0x57   :  { %1049 = vmatpush3.bf16.msra.mxu1 %v1174_v6  ;;  %1074 = vmatprep.mubr.msk.bf16.mxu0 %vm151_vm0, %v117_v29  ;;  %s1303_s29 = scalar_lea.vmem %s922_s14, 512  ;;  %p1308_p5 = scmp.lt.s32.totalorder %s922_s14, %s922_s14 }
  0x58   :  { %1054 = vmatprep.subr.bf16.mxu1 %v1176_v25  ;;  %p1304_p4 = scmp.ne.s32.totalorder %s922_s14, %s1303_s29  ;;  %p1309_p6 = scmp.lt.s32.totalorder %s1303_s29, %s1303_s29 }
  0x59   :  { %1073 = vmatpush3.bf16.msra.mxu0 %v1181_v26 }
  0x5a   :  { %1051 = vmatmul.mubr.msk.bf16.vlgmr.msra.gmra.mrb[0].mxu1 %vm151_vm0, %v118_v30  ;;  %1090 = vmatprep.subr.bf16.mxu0 %v1187_v32  ;;  %p1310_p7 = por %p1309_p6, %p1308_p5 }
  0x5b   :  { %1055 = vmatpush3.bf16.msra.mxu1 %v1176_v25  ;;  %1062 = vmatprep.mubr.msk.bf16.mxu1 %vm151_vm0, %v117_v29 }
  0x5c   :  { %1056 = vmatprep.subr.bf16.mxu1 %v1178_v31  ;;  %1075 = vmatmul.mubr.msk.bf16.vlgmr.msra.gmra.mrb[0].mxu0 %vm151_vm0, %v118_v30  ;;  %p1311_p8 = pnand %p1310_p7, %p1304_p4 }
  0x5d   :  { %1091 = vmatpush3.bf16.msra.mxu0 %v1187_v32 }
  0x5e   :  { %1092 = vmatprep.subr.bf16.mxu0 %v1191_v40 }
  0x5f   :  { %1057 = vmatpush3.bf16.msra.mxu1 %v1178_v31 }
  0x60   :  { %1058 = vmatprep.subr.bf16.mxu1 %v1180_v33 }
  0x61   :  { %1093 = vmatpush3.bf16.msra.mxu0 %v1191_v40  ;;  %v1208_v40 = vld [vmem:[#allocation7 + $0x98] sm:$0xff]  }
  0x62   :  { %1094 = vmatprep.subr.bf16.mxu0 %v1193_v42 }
  0x63   :  { %1059 = vmatpush3.bf16.msra.mxu1 %v1180_v33 }
  0x64   :  { %1060 = vmatprep.subr.bf16.mxu1 %v1182_v34 }
  0x65   :  { %1095 = vmatpush3.bf16.msra.mxu0 %v1193_v42  ;;  %v1210_v42 = vld [vmem:[#allocation7 + $0xa8] sm:$0xff]  }
  0x66   :  { %1096 = vmatprep.subr.bf16.mxu0 %v1195_v44 }
  0x67   :  { %1061 = vmatpush3.bf16.msra.mxu1 %v1182_v34 }
  0x68   :  { %1078 = vmatprep.subr.bf16.mxu1 %v1183_v35 }
  0x69   :  { %1097 = vmatpush3.bf16.msra.mxu0 %v1195_v44  ;;  %v1212_v44 = vld [vmem:[#allocation7 + $0xb8] sm:$0xff]  }
  0x6a   :  { %1063 = vmatmul.mubr.msk.bf16.vlgmr.msra.gmra.mrb[4].mxu1 %vm151_vm0, %v118_v30  ;;  %1098 = vmatprep.subr.bf16.mxu0 %v1197_v46 }
  0x6b   :  { %1079 = vmatpush3.bf16.msra.mxu1 %v1183_v35  ;;  %1086 = vmatprep.mubr.msk.bf16.mxu1 %vm151_vm0, %v1456_v4 }
  0x6c   :  { %1080 = vmatprep.subr.bf16.mxu1 %v1184_v36 }
  0x6d   :  { %1099 = vmatpush3.bf16.msra.mxu0 %v1197_v46 }
  0x6e   :  { %1100 = vmatprep.subr.bf16.mxu0 %v1199_v48 }
  0x6f   :  { %1081 = vmatpush3.bf16.msra.mxu1 %v1184_v36 }
  0x70   :  { %1082 = vmatprep.subr.bf16.mxu1 %v1185_v37 }
  0x71   :  { %1101 = vmatpush3.bf16.msra.mxu0 %v1199_v48 }
  0x72   :  { %1102 = vmatprep.subr.bf16.mxu0 %v1201_v50 }
  0x73   :  { %1083 = vmatpush3.bf16.msra.mxu1 %v1185_v37 }
  0x74   :  { %1084 = vmatprep.subr.bf16.mxu1 %v1186_v38 }
  0x75   :  { %1103 = vmatpush3.bf16.msra.mxu0 %v1201_v50 }
  0x76   :  { %1104 = vmatprep.subr.bf16.mxu0 %v1203_v52 }
  0x77   :  { %1085 = vmatpush3.bf16.msra.mxu1 %v1186_v38  ;;  %v1206_v38 = vld [vmem:[#allocation7 + $0x88] sm:$0xff]  }
  0x78   :  { %1110 = vmatprep.subr.bf16.mxu1 %v1189_v39 }
  0x79   :  { %1105 = vmatpush3.bf16.msra.mxu0 %v1203_v52 }
  0x7a   :  { %1087 = vmatmul.mubr.msk.bf16.vlgmr.msra.gmra.mrb[8].mxu1 %vm151_vm0, %v1463_v9  ;;  %1130 = vmatprep.subr.bf16.mxu0 %v1205_v54 }
  0x7b   :  { %1111 = vmatpush3.bf16.msra.mxu1 %v1189_v39  ;;  %v1207_v39 = vld [vmem:[#allocation7 + $0x90] sm:$0xff]  }
  0x7c   :  { %1112 = vmatprep.subr.bf16.mxu1 %v1192_v41 }
  0x7f   :  { %1113 = vmatpush3.bf16.msra.mxu1 %v1192_v41  ;;  %v1209_v41 = vld [vmem:[#allocation7 + $0xa0] sm:$0xff]  }
  0x80   :  { %1114 = vmatprep.subr.bf16.mxu1 %v1194_v43 }
  0x83   :  { %1115 = vmatpush3.bf16.msra.mxu1 %v1194_v43  ;;  %v1211_v43 = vld [vmem:[#allocation7 + $0xb0] sm:$0xff]  }
  0x84   :  { %1116 = vmatprep.subr.bf16.mxu1 %v1196_v45 }
  0x87   :  { %1117 = vmatpush3.bf16.msra.mxu1 %v1196_v45 }
  0x88   :  { %1118 = vmatprep.subr.bf16.mxu1 %v1198_v47 }
  0x8b   :  { %1119 = vmatpush3.bf16.msra.mxu1 %v1198_v47 }
  0x8c   :  { %1120 = vmatprep.subr.bf16.mxu1 %v1200_v49 }
  0x8f   :  { %1121 = vmatpush3.bf16.msra.mxu1 %v1200_v49 }
  0x90   :  { %1122 = vmatprep.subr.bf16.mxu1 %v1202_v51 }
  0x93   :  { %1123 = vmatpush3.bf16.msra.mxu1 %v1202_v51 }
  0x94   :  { %1124 = vmatprep.subr.bf16.mxu1 %v1204_v53 }
  0x97   :  { %1125 = vmatpush3.bf16.msra.mxu1 %v1204_v53 }
 0x12d   :  { %v1052_v55 = vpop.f32.mrb[0].mxu1 }
 0x12e   :  { %v379_v56 = vrot.slane %v1052_v55, 7  ;;  %v192_v57 = vpop.f32.mrb[1].mxu1 }
 0x12f   :  { %v1053_v58 = vpop.f32.mrb[2].mxu1  ;;  %v376_v61 = vrot.slane %v192_v57, 7  ;;  %v1076_v63 = vpop.f32.mrb[0].mxu0 }
 0x130   :  { %v380_v59 = vrot.slane %v1053_v58, 7  ;;  %v195_v60 = vpop.f32.mrb[3].mxu1  ;;  %v400_v0 = vrot.slane %v1076_v63, 1  ;;  %v356_v1 = vpop.f32.mrb[1].mxu0  ;;  %v387_v12 = vsel %vm375_vm1, 0.0, %v379_v56 }
 0x131   :  { %v377_v62 = vrot.slane %v195_v60, 7  ;;  %v397_v3 = vrot.slane %v356_v1, 1  ;;  %v1077_v4 = vpop.f32.mrb[2].mxu0  ;;  %v386_v15 = vsel %vm375_vm1, 0.0, %v376_v61 }
 0x132   :  { %v381_v2 = vsel %vm375_vm1, %v379_v56, %v380_v59  ;;  %v401_v6 = vrot.slane %v1077_v4, 1  ;;  %v359_v7 = vpop.f32.mrb[3].mxu0 }
 0x133   :  { %v378_v5 = vsel %vm375_vm1, %v376_v61, %v377_v62  ;;  %v398_v8 = vrot.slane %v359_v7, 1 }
 0x134   :  { %v402_v9 = vsel %vm396_vm2, %v400_v0, %v401_v6  ;;  %v408_v22 = vsel %vm396_vm2, %v401_v6, 0.0 }
 0x135   :  { %v399_v10 = vsel %vm396_vm2, %v397_v3, %v398_v8  ;;  %v407_v25 = vsel %vm396_vm2, %v398_v8, 0.0 }
 0x13d   :  { %v1064_v11 = vpop.f32.mrb[4].mxu1 }
 0x13e   :  { %v390_v13 = vadd.f32 %v1064_v11, %v387_v12  ;;  %v274_v14 = vpop.f32.mrb[5].mxu1 }
 0x13f   :  { %v388_v17 = vadd.f32 %v386_v15, %v274_v14  ;;  %v1065_v18 = vpop.f32.mrb[6].mxu1 }
 0x140   :  { %v411_v19 = vadd.f32 %v402_v9, %v390_v13  ;;  %v391_v20 = vadd.f32 %v1065_v18, %v381_v2  ;;  %v277_v21 = vpop.f32.mrb[7].mxu1 }
 0x141   :  { %v409_v23 = vadd.f32 %v399_v10, %v388_v17  ;;  %v389_v24 = vadd.f32 %v378_v5, %v277_v21 }
 0x142   :  { %v422_v26 = vadd.f32 %v955_v16, %v411_v19  ;;  %v412_v27 = vadd.f32 %v408_v22, %v391_v20 }
 0x143   :  { %v420_v28 = vadd.f32 %v955_v16, %v409_v23  ;;  %v410_v29 = vadd.f32 %v407_v25, %v389_v24 }
 0x144   :  { %v423_v30 = vadd.f32 %v955_v16, %v412_v27  ;;  %v426_v32 = vmax.f32 %v422_v26, 0.0 }
 0x145   :  { %v421_v31 = vadd.f32 %v955_v16, %v410_v29  ;;  %v424_v34 = vmax.f32 %v420_v28, 0.0 }
 0x146   :  { %v427_v33 = vmax.f32 %v423_v30, 0.0 }
 0x147   :  { %v425_v35 = vmax.f32 %v421_v31, 0.0 }
 0x148   :  { %v429_v36 = vpack.c.bf16 %v427_v33, %v426_v32 }
 0x149   :  { %v428_v37 = vpack.c.bf16 %v425_v35, %v424_v34 }
 0x14b   :  { %1106 = vmatprep.mubr.bf16.mxu0 %v428_v37  ;;  %1126 = vmatprep.mubr.bf16.mxu1 %v428_v37 }
 0x14c   :  { %1107 = vmatmul.mubr.bf16.vlgmr.msra.gmra.mrb[4].mxu0 %v429_v36  ;;  %1127 = vmatmul.mubr.bf16.vlgmr.msra.gmra.mrb[8].mxu1 %v429_v36 }
 0x14d   :  { %1131 = vmatpush3.bf16.msra.mxu0 %v1205_v54  ;;  %1146 = vmatprep.mubr.bf16.mxu0 %v428_v37 }
 0x14e   :  { %1132 = vmatprep.subr.bf16.mxu0 %v1206_v38 }
 0x151   :  { %1133 = vmatpush3.bf16.msra.mxu0 %v1206_v38 }
 0x152   :  { %1134 = vmatprep.subr.bf16.mxu0 %v1207_v39 }
 0x155   :  { %1135 = vmatpush3.bf16.msra.mxu0 %v1207_v39 }
 0x156   :  { %1136 = vmatprep.subr.bf16.mxu0 %v1208_v40 }
 0x159   :  { %1137 = vmatpush3.bf16.msra.mxu0 %v1208_v40 }
 0x15a   :  { %1138 = vmatprep.subr.bf16.mxu0 %v1209_v41 }
 0x15d   :  { %1139 = vmatpush3.bf16.msra.mxu0 %v1209_v41 }
 0x15e   :  { %1140 = vmatprep.subr.bf16.mxu0 %v1210_v42 }
 0x161   :  { %1141 = vmatpush3.bf16.msra.mxu0 %v1210_v42 }
 0x162   :  { %1142 = vmatprep.subr.bf16.mxu0 %v1211_v43 }
 0x165   :  { %1143 = vmatpush3.bf16.msra.mxu0 %v1211_v43 }
 0x166   :  { %1144 = vmatprep.subr.bf16.mxu0 %v1212_v44 }
 0x169   :  { %1145 = vmatpush3.bf16.msra.mxu0 %v1212_v44 }
 0x16c   :  { %1147 = vmatmul.mubr.bf16.vlgmr.msra.gmra.mrb[8].mxu0 %v429_v36 }
 0x21f   :  { %v1108_v45 = vpop.f32.mrb[4].mxu0  ;;  %v1128_v46 = vpop.f32.mrb[8].mxu1 }
 0x220   :  { %v875_v47 = vrot.slane %v1108_v45, 7  ;;  %v625_v48 = vpop.f32.mrb[5].mxu0  ;;  %v739_v49 = vpop.f32.mrb[9].mxu1 }
 0x221   :  { %v872_v50 = vrot.slane %v625_v48, 7  ;;  %v1109_v51 = vpop.f32.mrb[6].mxu0  ;;  %v1129_v52 = vpop.f32.mrb[10].mxu1 }
 0x222   :  { %v883_v53 = vsel %vm375_vm1, 0.0, %v875_v47  ;;  %v876_v54 = vrot.slane %v1109_v51, 7  ;;  %v628_v55 = vpop.f32.mrb[7].mxu0  ;;  %v742_v56 = vpop.f32.mrb[11].mxu1 }
 0x223   :  { %v886_v57 = vadd.f32 %v1128_v46, %v883_v53  ;;  %v882_v58 = vsel %vm375_vm1, 0.0, %v872_v50  ;;  %v873_v59 = vrot.slane %v628_v55, 7 }
 0x224   :  { %v884_v60 = vadd.f32 %v882_v58, %v739_v49  ;;  %v877_v61 = vsel %vm375_vm1, %v875_v47, %v876_v54 }
 0x225   :  { %v887_v62 = vadd.f32 %v1129_v52, %v877_v61  ;;  %v874_v63 = vsel %vm375_vm1, %v872_v50, %v873_v59 }
 0x226   :  { %v885_v0 = vadd.f32 %v874_v63, %v742_v56 }
 0x23f   :  { %v1148_v1 = vpop.f32.mrb[8].mxu0 }
 0x240   :  { %v853_v2 = vpop.f32.mrb[9].mxu0  ;;  %v895_v4 = vrot.slane %v1148_v1, 1 }
 0x241   :  { %v1149_v3 = vpop.f32.mrb[10].mxu0  ;;  %v892_v7 = vrot.slane %v853_v2, 1 }
 0x242   :  { %v896_v5 = vrot.slane %v1149_v3, 1  ;;  %v856_v6 = vpop.f32.mrb[11].mxu0 }
 0x243   :  { %v893_v8 = vrot.slane %v856_v6, 1 }
 0x244   :  { %v897_v9 = vsel %vm396_vm2, %v895_v4, %v896_v5  ;;  %v903_v10 = vsel %vm396_vm2, %v896_v5, 0.0 }
 0x245   :  { %v906_v11 = vadd.f32 %v897_v9, %v886_v57  ;;  %v907_v12 = vadd.f32 %v903_v10, %v887_v62  ;;  %v894_v13 = vsel %vm396_vm2, %v892_v7, %v893_v8  ;;  %v902_v14 = vsel %vm396_vm2, %v893_v8, 0.0 }
 0x246   :  { %v904_v15 = vadd.f32 %v894_v13, %v884_v60  ;;  %v905_v16 = vadd.f32 %v902_v14, %v885_v0 }
 0x247   :  { %914 = vst [vmem:[#allocation10 + $0x10] sm:$0xff] %v906_v11  ;;  %915 = vst [vmem:[#allocation10 + $0x18] sm:$0xff] %v907_v12 }
 0x248   :  { %912 = vst [vmem:[#allocation10] sm:$0xff] %v904_v15  ;;  %913 = vst [vmem:[#allocation10 + $0x8] sm:$0xff] %v905_v16 }
 0x249   :  { %1314 = shalt.err (!%p1311_p8)
}
 0x24a   :  { %s1315_s9 = scalar_lea.hbm %s1518_s7, 512 }
 0x24b   :  { %p1316_p9 = scmp.ne.s32.totalorder %s1518_s7, %s1315_s9  ;;  %p1319_p10 = scmp.lt.u32.totalorder %s1315_s9, %s1518_s7 }
 0x24d   :  { %p1321_p11 = pnand %p1319_p10, %p1316_p9 }
 0x24f   :  { %1324 = shalt.err (!%p1321_p11)
}
 0x250   :  { %s1340_s16 = smov 128   ;;  %s1341_s0 = smov 8  }
 0x251   :  { %927 = dma.vmem_to_hbm [thread:$0]  %s922_s14, 512, %s1518_s7, [#allocation4], %s1340_s16, %s1340_s16, %s1341_s0  }
 0x252   :  { %1331 = dma.done.wait [#allocation4], 512  }
 0x253   :  { %1332 = vsyncadd [#allocation4], 4294966784 }
 0x254   :  { %931 = vsyncpa [#allocation3], 1 }
 0x255   :  { %932 = vsyncpa [#allocation6], 1 }
 0x256   :  { %933 = vsyncpa [#allocation9], 1 }
 0x257   :  { %934 = vsyncpa [#allocation4], 1 }

</bundles_post_ra>
